<compile_context>
chip_gen: v7x
topology: tpu7x:2x2x1
jax: 0.10.0
libtpu: 0.0.40
codegen_flags: <defaults>
</compile_context>

<pallas_src>
import jax
import jax.numpy as jnp
from jax.experimental import pallas as pl
from jax.experimental.pallas import tpu as pltpu


def _round_up(v, m):
    return (v + m - 1) // m * m


def _vmem_capacity_bytes():
    """Physical VMEM per core; conservative (v7x-sized) fallback."""
    try:
        return int(pltpu.get_tpu_info().vmem_capacity_bytes)
    except Exception:
        return 64 * 1024 * 1024


def _choose_feature_tile(dim, target, waste_frac=0.2):
    """Pick a lane-aligned tile (multiple of 128, <= target) and the padded
    dim (multiple of the tile).  Prefers the largest tile whose zero-padding
    waste is <= waste_frac; otherwise minimizes padded size."""
    dim_128 = _round_up(dim, 128)
    hi = min(target, dim_128)
    candidates = list(range(hi, 0, -128))
    for tile in candidates:
        pad = _round_up(dim, tile)
        if (pad - dim) / pad <= waste_frac:
            return tile, pad
    best = min(candidates, key=lambda t: (_round_up(dim, t), -t))
    return best, _round_up(dim, best)


def _choose_row_tile(n, candidates, waste_frac=0.2):
    """Row (M) tile: single exact-ish tile for small batches, else the largest
    candidate whose padding waste is small."""
    n16 = _round_up(n, 16)                    # 16-aligned (bf16 sublane packing)
    if n16 <= candidates[-1]:
        return n16, n16
    for tm in candidates:
        pad = _round_up(n, tm)
        if (pad - n) / pad <= waste_frac:
            return tm, pad
    tm = candidates[-1]
    return tm, _round_up(n, tm)


def _disentangler_kernel(x_ref, w_ref, s_ref, t_ref, o_ref, acc_ref):
    # grid = (M_tiles, N_tiles, K_tiles); K (reduction) is the last axis.
    k = pl.program_id(2)

    @pl.when(k == 0)
    def _():
        acc_ref[...] = jnp.zeros_like(acc_ref)

    # x (tm, tk) contracted with native-layout W (tn, tk) on their last dims:
    # no transposed copy of W is ever materialized (host or VMEM).
    acc_ref[...] += jax.lax.dot_general(
        x_ref[...], w_ref[...],
        dimension_numbers=(((1,), (1,)), ((), ())),
        preferred_element_type=jnp.float32)

    @pl.when(k == pl.num_programs(2) - 1)
    def _():
        # Folded-BN epilogue: per-feature scale + shift, then ReLU.
        y = acc_ref[...] * s_ref[...] + t_ref[...]
        o_ref[...] = jnp.maximum(y, 0.0).astype(o_ref.dtype)


def disentangler_forward(x, w, b, gamma, beta, running_mean, running_var, *,
                         eps=1e-5, use_bf16=True):
    """x: [N, D_in].  w: [D_out, D_in] (native PyTorch Linear layout).

    Returns relu(BN_eval(x @ w.T + b)) with shape [N, D_out]."""
    N, D_in = x.shape
    D_out = w.shape[0]

    # ---- BN fold: per-feature affine applied in the kernel epilogue --------
    s = (gamma * jax.lax.rsqrt(running_var.astype(jnp.float32) + eps)
         ).astype(jnp.float32)                          # (D_out,)
    t = ((b - running_mean) * s + beta).astype(jnp.float32)

    # ---- generation-aware tile selection -----------------------------------
    vmem_cap = _vmem_capacity_bytes()
    big_vmem = vmem_cap >= (100 << 20)                  # v5e / v6e: 128 MiB
    row_candidates = (512, 256, 128) if big_vmem else (256, 128)
    tn_target = 1024 if big_vmem else 512
    tk_target = 512

    tm, n_pad = _choose_row_tile(N, row_candidates)
    tk, din_pad = _choose_feature_tile(D_in, tk_target)
    tn, dout_pad = _choose_feature_tile(D_out, tn_target)

    # v7x megacore: ensure >= 2 parallel (M, N) tiles so the grid can be
    # sharded across both TensorCores (near-free on 1-TC parts).
    if (n_pad // tm) * (dout_pad // tn) < 2:
        for cand in range(tn - 128, 0, -128):
            if dout_pad % cand == 0:
                tn = cand
                break

    mm_dtype = jnp.bfloat16 if use_bf16 else x.dtype

    def _prep(a, rows, cols, pad_rows, pad_cols, dtype):
        if (pad_rows, pad_cols) != (rows, cols):
            a = jnp.pad(a, ((0, pad_rows - rows), (0, pad_cols - cols)))
        if a.dtype != dtype:
            a = a.astype(dtype)
        return a

    # For aligned shapes + pre-cast (bf16) params these are no-ops: no host
    # pass over x / W before the kernel.
    x_p = _prep(x, N, D_in, n_pad, din_pad, mm_dtype)
    w_p = _prep(w, D_out, D_in, dout_pad, din_pad, mm_dtype)
    s_p = _prep(s.reshape(1, D_out), 1, D_out, 1, dout_pad, jnp.float32)
    t_p = _prep(t.reshape(1, D_out), 1, D_out, 1, dout_pad, jnp.float32)

    grid = (n_pad // tm, dout_pad // tn, din_pad // tk)
    m_tiles, k_tiles = grid[0], grid[2]

    # Weight-bandwidth-bound regime: single M tile, several K steps.
    deep_w = (m_tiles == 1) and (k_tiles >= 3)
    w_bufs = 3 if deep_w else 2

    # ---- VMEM budget (double-buffered tiles + f32 accumulator) -------------
    in_isz = jnp.dtype(mm_dtype).itemsize
    out_isz = jnp.dtype(x.dtype).itemsize
    vmem_need = (2 * tm * tk * in_isz            # x tiles
                 + w_bufs * tk * tn * in_isz     # weight tiles
                 + 2 * 2 * tn * 4                # s, t tiles
                 + 2 * tm * tn * out_isz         # output tiles
                 + tm * tn * 4)                  # accumulator
    # Cap at 75% of physical VMEM (<=48 MiB on v7x, <=96 MiB on v5e/v6e).
    vmem_limit = int(min(max(2 * vmem_need, 32 << 20), (vmem_cap * 3) // 4))

    cost = pl.CostEstimate(
        flops=2 * n_pad * din_pad * dout_pad,
        transcendentals=0,
        bytes_accessed=(x_p.size * in_isz + w_p.size * in_isz
                        + s_p.size * 4 + t_p.size * 4
                        + n_pad * dout_pad * out_isz))

    def run(deep_weight_pipeline):
        if deep_weight_pipeline:
            w_spec = pl.BlockSpec((tn, tk), lambda i, j, k: (j, k),
                                  pipeline_mode=pl.Buffered(3))
        else:
            w_spec = pl.BlockSpec((tn, tk), lambda i, j, k: (j, k))
        return pl.pallas_call(
            _disentangler_kernel,
            out_shape=jax.ShapeDtypeStruct((n_pad, dout_pad), x.dtype),
            grid_spec=pltpu.PrefetchScalarGridSpec(
                num_scalar_prefetch=0,
                grid=grid,
                in_specs=[
                    pl.BlockSpec((tm, tk), lambda i, j, k: (i, k)),  # x rows
                    w_spec,                                          # native W
                    pl.BlockSpec((1, tn), lambda i, j, k: (0, j)),   # BN scale
                    pl.BlockSpec((1, tn), lambda i, j, k: (0, j)),   # BN shift
                ],
                out_specs=pl.BlockSpec((tm, tn), lambda i, j, k: (i, j)),
                scratch_shapes=[pltpu.VMEM((tm, tn), jnp.float32)],
            ),
            compiler_params=pltpu.CompilerParams(
                dimension_semantics=("parallel", "parallel", "arbitrary"),
                vmem_limit_bytes=vmem_limit),
            cost_estimate=cost,
        )(x_p, w_p, s_p, t_p)

    if deep_w:
        try:
            out = run(True)
        except Exception:
            # pipeline_mode / Buffered unsupported on this jax/libtpu build.
            out = run(False)
    else:
        out = run(False)

    if (n_pad, dout_pad) != (N, D_out):
        out = out[:N, :D_out]          # only pay the slice when padding exists
    return out


def _reference(x, w, b, gamma, beta, running_mean, running_var, eps=1e-5):
    y = x @ w.T + b
    y = (y - running_mean) / jnp.sqrt(running_var + eps) * gamma + beta
    return jnp.maximum(y, 0.0)


if __name__ == "__main__":
    key = jax.random.PRNGKey(0)
    kx, kw, kb, kg, kbe, km, kv = jax.random.split(key, 7)

    N, D = 8, 128  # small batch, lane-aligned emb_dim

    x = jax.random.normal(kx, (N, D), dtype=jnp.float32)
    # PyTorch Linear layout: weight is (out_features, in_features).
    w = jax.random.normal(kw, (D, D), dtype=jnp.float32) * (1.0 / jnp.sqrt(D))
    b = jax.random.normal(kb, (D,), dtype=jnp.float32) * 0.1
    # BatchNorm1d params / running stats (eval mode).
    gamma = 1.0 + 0.1 * jax.random.normal(kg, (D,), dtype=jnp.float32)
    beta = 0.1 * jax.random.normal(kbe, (D,), dtype=jnp.float32)
    running_mean = 0.1 * jax.random.normal(km, (D,), dtype=jnp.float32)
    running_var = 1.0 + 0.1 * jax.random.uniform(kv, (D,), dtype=jnp.float32)

    ref = _reference(x, w, b, gamma, beta, running_mean, running_var)

    # Exact (f32 MXU) path — tight tolerance.
    out_f32 = jax.block_until_ready(
        disentangler_forward(x, w, b, gamma, beta, running_mean, running_var,
                             use_bf16=False))
    assert out_f32.shape == (N, D)
    assert jnp.allclose(out_f32, ref, atol=1e-4, rtol=1e-4), "f32 path mismatch"

    # Default fast path: bf16 MXU inputs, f32 accumulation.
    out_bf16 = jax.block_until_ready(
        disentangler_forward(x, w, b, gamma, beta, running_mean, running_var))
    assert out_bf16.shape == (N, D)
    assert jnp.allclose(out_bf16, ref, atol=5e-2, rtol=5e-2), "bf16 path mismatch"

    # Non-tile-aligned shape: exercises padding, conditional slice and the
    # megacore N-split path.
    N2, D2 = 37, 192
    k2 = jax.random.PRNGKey(1)
    k2x, k2w, k2b = jax.random.split(k2, 3)
    x2 = jax.random.normal(k2x, (N2, D2), dtype=jnp.float32)
    w2 = jax.random.normal(k2w, (D2, D2), dtype=jnp.float32) * (1.0 / jnp.sqrt(D2))
    b2 = jax.random.normal(k2b, (D2,), dtype=jnp.float32) * 0.1
    g2 = jnp.ones((D2,), jnp.float32)
    be2 = jnp.zeros((D2,), jnp.float32)
    m2 = jnp.zeros((D2,), jnp.float32)
    v2 = jnp.ones((D2,), jnp.float32)
    ref2 = _reference(x2, w2, b2, g2, be2, m2, v2)
    out2 = jax.block_until_ready(
        disentangler_forward(x2, w2, b2, g2, be2, m2, v2))
    assert out2.shape == (N2, D2)
    assert jnp.allclose(out2, ref2, atol=5e-2, rtol=5e-2), "padded path mismatch"

    print("KERNEL_OK")
</pallas_src>

<mosaic_0001>
module attributes {stable_mosaic.version = 11 : i64} {
  func.func @_disentangler_kernel(%arg0: i32, %arg1: i32, %arg2: i32, %arg3: memref<16x128xf32, #tpu.memory_space<vmem>>, %arg4: memref<128x128xf32, #tpu.memory_space<vmem>>, %arg5: memref<1x128xf32, #tpu.memory_space<vmem>>, %arg6: memref<1x128xf32, #tpu.memory_space<vmem>>, %arg7: memref<16x128xf32, #tpu.memory_space<vmem>>, %arg8: memref<16x128xf32, #tpu.memory_space<vmem>>) attributes {dimension_semantics = [#tpu.dimension_semantics<parallel>, #tpu.dimension_semantics<parallel>, #tpu.dimension_semantics<arbitrary>], iteration_bounds = array<i64: 1, 1, 1>, scalar_prefetch = 0 : i64, scratch_operands = 1 : i64, tpu.core_type = #tpu.core_type<tc>, window_params = [{transform_indices = @transform_0, window_bounds = array<i64: 16, 128>}, {transform_indices = @transform_1, window_bounds = array<i64: 128, 128>}, {transform_indices = @transform_2, window_bounds = array<i64: 1, 128>}, {transform_indices = @transform_3, window_bounds = array<i64: 1, 128>}, {transform_indices = @transform_4, window_bounds = array<i64: 16, 128>}]} {
    %c0_i32 = arith.constant 0 : i32
    %0 = arith.cmpi eq, %arg2, %c0_i32 : i32
    %1 = arith.extui %0 : i1 to i32
    %c0_i32_0 = arith.constant 0 : i32
    %2 = arith.cmpi ne, %1, %c0_i32_0 : i32
    scf.if %2 {
      %cst_10 = arith.constant 0.000000e+00 : f32
      %12 = vector.broadcast %cst_10 : f32 to vector<16x128xf32>
      %c0_11 = arith.constant 0 : index
      %c0_12 = arith.constant 0 : index
      %13 = vector.load %arg8[%c0_11, %c0_12] : memref<16x128xf32, #tpu.memory_space<vmem>>, vector<16x128xf32>
      tpu.vector_store %arg8[%c0_11, %c0_12], %12 {strides = array<i32>} : memref<16x128xf32, #tpu.memory_space<vmem>>, vector<16x128xf32>,
    } else {
    }
    %c0 = arith.constant 0 : index
    %c0_1 = arith.constant 0 : index
    %3 = vector.load %arg8[%c0, %c0_1] : memref<16x128xf32, #tpu.memory_space<vmem>>, vector<16x128xf32>
    %c0_2 = arith.constant 0 : index
    %c0_3 = arith.constant 0 : index
    %4 = vector.load %arg3[%c0_2, %c0_3] : memref<16x128xf32, #tpu.memory_space<vmem>>, vector<16x128xf32>
    %c0_4 = arith.constant 0 : index
    %c0_5 = arith.constant 0 : index
    %5 = vector.load %arg4[%c0_4, %c0_5] : memref<128x128xf32, #tpu.memory_space<vmem>>, vector<128x128xf32>
    %cst = arith.constant dense<0.000000e+00> : vector<16x128xf32>
    %6 = tpu.matmul %4, %5, %cst {dimension_numbers = #tpu.dot_dimension_numbers<[1], [1], [0], [0], [0, 0, 1, 0], [], []>} : vector<16x128xf32>, vector<128x128xf32>, vector<16x128xf32> -> vector<16x128xf32>
    %7 = arith.addf %3, %6 : vector<16x128xf32>
    %c0_6 = arith.constant 0 : index
    %c0_7 = arith.constant 0 : index
    %8 = vector.load %arg8[%c0_6, %c0_7] : memref<16x128xf32, #tpu.memory_space<vmem>>, vector<16x128xf32>
    tpu.vector_store %arg8[%c0_6, %c0_7], %7 {strides = array<i32>} : memref<16x128xf32, #tpu.memory_space<vmem>>, vector<16x128xf32>,
    %c0_i32_8 = arith.constant 0 : i32
    %9 = arith.cmpi eq, %arg2, %c0_i32_8 : i32
    %10 = arith.extui %9 : i1 to i32
    %c0_i32_9 = arith.constant 0 : i32
    %11 = arith.cmpi ne, %10, %c0_i32_9 : i32
    scf.if %11 {
      %c0_10 = arith.constant 0 : index
      %c0_11 = arith.constant 0 : index
      %12 = vector.load %arg8[%c0_10, %c0_11] : memref<16x128xf32, #tpu.memory_space<vmem>>, vector<16x128xf32>
      %c0_12 = arith.constant 0 : index
      %c0_13 = arith.constant 0 : index
      %13 = vector.load %arg5[%c0_12, %c0_13] : memref<1x128xf32, #tpu.memory_space<vmem>>, vector<1x128xf32>
      %14 = vector.broadcast %13 : vector<1x128xf32> to vector<16x128xf32>
      %15 = arith.mulf %12, %14 : vector<16x128xf32>
      %c0_14 = arith.constant 0 : index
      %c0_15 = arith.constant 0 : index
      %16 = vector.load %arg6[%c0_14, %c0_15] : memref<1x128xf32, #tpu.memory_space<vmem>>, vector<1x128xf32>
      %17 = vector.broadcast %16 : vector<1x128xf32> to vector<16x128xf32>
      %18 = arith.addf %15, %17 : vector<16x128xf32>
      %cst_16 = arith.constant 0.000000e+00 : f32
      %19 = vector.broadcast %cst_16 : f32 to vector<16x128xf32>
      %20 = arith.maximumf %18, %19 : vector<16x128xf32>
      %c0_17 = arith.constant 0 : index
      %c0_18 = arith.constant 0 : index
      %21 = vector.load %arg7[%c0_17, %c0_18] : memref<16x128xf32, #tpu.memory_space<vmem>>, vector<16x128xf32>
      tpu.vector_store %arg7[%c0_17, %c0_18], %20 {strides = array<i32>} : memref<16x128xf32, #tpu.memory_space<vmem>>, vector<16x128xf32>,
    } else {
    }
    return
  }
  func.func @transform_0(%arg0: i32, %arg1: i32, %arg2: i32) -> (i32, i32) {
    %c0_i32 = arith.constant 0 : i32
    return %arg0, %arg2 : i32, i32
  }
  func.func @transform_1(%arg0: i32, %arg1: i32, %arg2: i32) -> (i32, i32) {
    %c0_i32 = arith.constant 0 : i32
    return %arg1, %arg2 : i32, i32
  }
  func.func @transform_2(%arg0: i32, %arg1: i32, %arg2: i32) -> (i32, i32) {
    %c0_i32 = arith.constant 0 : i32
    %c0_i32_0 = arith.constant 0 : i32
    return %c0_i32, %arg1 : i32, i32
  }
  func.func @transform_3(%arg0: i32, %arg1: i32, %arg2: i32) -> (i32, i32) {
    %c0_i32 = arith.constant 0 : i32
    %c0_i32_0 = arith.constant 0 : i32
    return %c0_i32, %arg1 : i32, i32
  }
  func.func @transform_4(%arg0: i32, %arg1: i32, %arg2: i32) -> (i32, i32) {
    %c0_i32 = arith.constant 0 : i32
    return %arg0, %arg1 : i32, i32
  }
}

</mosaic_0001>

<bundles_post_ra>
// kernel: tpu_custom_call.1
= control target key start
LH: loop header
LB: loop body
LE: loop exit
PB: predicated region body
PF: predicated region fallthrough
CT: control target
= control target key end

     0   :  { %9 = vsyncpa [#allocation4], 0  ;;  %s441_s0 = inlined_call_operand.hbm [shape: f32[16,128], index: 0, kind: input, shape index: {}]   ;;  %s442_s1 = inlined_call_operand.hbm [shape: f32[128,128], index: 1, kind: input, shape index: {}]   ;;  %s443_s2 = inlined_call_operand.vmem [shape: f32[1,128], index: 2, kind: input, shape index: {}]   ;;  %s444_s3 = inlined_call_operand.vmem [shape: f32[1,128], index: 3, kind: input, shape index: {}]   ;;  %s445_s4 = inlined_call_operand.hbm [shape: f32[16,128], index: 4, kind: output, shape index: {}]  }
   0x1   :  { %10 = vsyncpa [#allocation7], 0 }
   0x2   :  { %11 = vsyncpa [#allocation5], 0  ;;  %s360_s15 = smov [#allocation3]   ;;  %s288_s19 = scalar_lea.hbm %s441_s0, 256 }
   0x3   :  { %s17_s16 = sshll.u32 %s360_s15, 4  ;;  %p289_p0 = scmp.ne.s32.totalorder %s441_s0, %s288_s19  ;;  %s18_s16 = int_to_ptr.vmem [resolvable:$true] %s17_s16 }
   0x4   :  { %p292_p1 = scmp.lt.u32.totalorder %s288_s19, %s441_s0 }
   0x6   :  { %p294_p2 = pnand %p292_p1, %p289_p0 }
   0x8   :  { %297 = shalt.err (!%p294_p2)
}
   0x9   :  { %s298_s24 = scalar_lea.vmem %s18_s16, 256  ;;  %p303_p4 = scmp.lt.s32.totalorder %s18_s16, %s18_s16 }
   0xa   :  { %p299_p3 = scmp.ne.s32.totalorder %s18_s16, %s298_s24  ;;  %p304_p5 = scmp.lt.s32.totalorder %s298_s24, %s298_s24 }
   0xc   :  { %p305_p6 = por %p304_p5, %p303_p4 }
   0xe   :  { %p306_p7 = pnand %p305_p6, %p299_p3 }
  0x10   :  { %309 = shalt.err (!%p306_p7)
}
  0x11   :  { %s361_s25 = smov 128   ;;  %s362_s26 = smov 8  }
  0x12   :  { %23 = dma.hbm_to_vmem [thread:$0]  %s441_s0, 256, %s18_s16, [#allocation4], %s361_s25, %s361_s25, %s362_s26  }
  0x13   :  { %s363_s29 = smov [#allocation6]   ;;  %s310_s7 = scalar_lea.hbm %s442_s1, 2048 }
  0x14   :  { %s29_s30 = sshll.u32 %s363_s29, 4  ;;  %p311_p8 = scmp.ne.s32.totalorder %s442_s1, %s310_s7  ;;  %s30_s30 = int_to_ptr.vmem [resolvable:$true] %s29_s30 }
  0x15   :  { %p314_p9 = scmp.lt.u32.totalorder %s310_s7, %s442_s1 }
  0x17   :  { %p316_p10 = pnand %p314_p9, %p311_p8 }
  0x19   :  { %319 = shalt.err (!%p316_p10)
}
  0x1a   :  { %s320_s12 = scalar_lea.vmem %s30_s30, 2048  ;;  %p325_p12 = scmp.lt.s32.totalorder %s30_s30, %s30_s30 }
  0x1b   :  { %p321_p11 = scmp.ne.s32.totalorder %s30_s30, %s320_s12  ;;  %p326_p13 = scmp.lt.s32.totalorder %s320_s12, %s320_s12 }
  0x1d   :  { %p327_p0 = por %p326_p13, %p325_p12 }
  0x1f   :  { %p328_p1 = pnand %p327_p0, %p321_p11 }
  0x21   :  { %331 = shalt.err (!%p328_p1)
}
  0x22   :  { %35 = dma.hbm_to_vmem [thread:$0]  %s442_s1, 2048, %s30_s30, [#allocation7], %s361_s25, %s361_s25, %s362_s26  }
  0x23   :  { %354 = dma.done.wait [#allocation4], 256  }
  0x24   :  { %355 = vsyncadd [#allocation4], 4294967040 }
  0x25   :  { %356 = dma.done.wait [#allocation7], 2048  }
  0x26   :  { %357 = vsyncadd [#allocation7], 4294965248  ;;  %v56_v0 = vld [vmem:[#allocation6] sm:$0xff]  ;;  %v57_v1 = vld [vmem:[#allocation6 + $0x8] sm:$0xff]  ;;  %s364_s17 = smov [#allocation8]  }
  0x27   :  { %v58_v2 = vld [vmem:[#allocation6 + $0x10] sm:$0xff]  ;;  %v251_v3 = vpack.c.bf16 %v57_v1, %v56_v0  ;;  %v59_v4 = vld [vmem:[#allocation6 + $0x18] sm:$0xff]  ;;  %v60_v7 = vld [vmem:[#allocation6 + $0x20] sm:$0xff]  ;;  %s183_s18 = sshll.u32 %s364_s17, 4  ;;  %s184_s18 = int_to_ptr.vmem [resolvable:$true] %s183_s18 }
  0x28   :  { %v255_v5 = vpack.c.bf16 %v59_v4, %v58_v2  ;;  %v54_v6 = vld [vmem:[#allocation3] sm:$0xff]  ;;  %v61_v8 = vld [vmem:[#allocation6 + $0x28] sm:$0xff]  ;;  %v63_v11 = vld [vmem:[#allocation6 + $0x38] sm:$0xff]  ;;  %s332_s19 = scalar_lea.vmem %s184_s18, 256  ;;  %p337_p3 = scmp.lt.s32.totalorder %s184_s18, %s184_s18 }
  0x29   :  { %252 = vmatprep.subr.bf16.mxu0 %v251_v3  ;;  %248 = vmatprep.mubr.f32.mxu0 %v54_v6  ;;  %v259_v9 = vpack.c.bf16 %v61_v8, %v60_v7  ;;  %v62_v10 = vld [vmem:[#allocation6 + $0x30] sm:$0xff]  ;;  %v64_v13 = vld [vmem:[#allocation6 + $0x40] sm:$0xff]  ;;  %v65_v14 = vld [vmem:[#allocation6 + $0x48] sm:$0xff]  ;;  %p333_p2 = scmp.ne.s32.totalorder %s184_s18, %s332_s19  ;;  %p338_p4 = scmp.lt.s32.totalorder %s332_s19, %s332_s19 }
  0x2a   :  { %254 = vmatpush3.bf16.xpose.msra.mxu0 %v251_v3  ;;  %v263_v12 = vpack.c.bf16 %v63_v11, %v62_v10  ;;  %v267_v15 = vpack.c.bf16 %v65_v14, %v64_v13  ;;  %v66_v16 = vld [vmem:[#allocation6 + $0x50] sm:$0xff]  ;;  %v67_v17 = vld [vmem:[#allocation6 + $0x58] sm:$0xff]  ;;  %v68_v19 = vld [vmem:[#allocation6 + $0x60] sm:$0xff] }
  0x2b   :  { %256 = vmatprep.subr.bf16.mxu0 %v255_v5  ;;  %v271_v18 = vpack.c.bf16 %v67_v17, %v66_v16  ;;  %v69_v20 = vld [vmem:[#allocation6 + $0x68] sm:$0xff]  ;;  %v70_v22 = vld [vmem:[#allocation6 + $0x70] sm:$0xff]  ;;  %v71_v23 = vld [vmem:[#allocation6 + $0x78] sm:$0xff]  ;;  %p339_p5 = por %p338_p4, %p337_p3 }
  0x2c   :  { %v275_v21 = vpack.c.bf16 %v69_v20, %v68_v19  ;;  %v279_v24 = vpack.c.bf16 %v71_v23, %v70_v22  ;;  %v55_v25 = vld [vmem:[#allocation3 + $0x8] sm:$0xff]  ;;  %v196_v26 = vld [vmem:[%s443_s2] ss:$0 sm:$0xff] }
  0x2d   :  { %v197_v28 = vld [vmem:[%s444_s3] ss:$0 sm:$0xff]  ;;  %p340_p6 = pnand %p339_p5, %p333_p2 }
  0x32   :  { %258 = vmatpush3.bf16.xpose.msra.mxu0 %v255_v5 }
  0x33   :  { %260 = vmatprep.subr.bf16.mxu0 %v259_v9 }
  0x3a   :  { %262 = vmatpush3.bf16.xpose.msra.mxu0 %v259_v9 }
  0x3b   :  { %264 = vmatprep.subr.bf16.mxu0 %v263_v12 }
  0x42   :  { %266 = vmatpush3.bf16.xpose.msra.mxu0 %v263_v12 }
  0x43   :  { %268 = vmatprep.subr.bf16.mxu0 %v267_v15 }
  0x4a   :  { %270 = vmatpush3.bf16.xpose.msra.mxu0 %v267_v15 }
  0x4b   :  { %272 = vmatprep.subr.bf16.mxu0 %v271_v18 }
  0x52   :  { %274 = vmatpush3.bf16.xpose.msra.mxu0 %v271_v18 }
  0x53   :  { %276 = vmatprep.subr.bf16.mxu0 %v275_v21 }
  0x5a   :  { %278 = vmatpush3.bf16.xpose.msra.mxu0 %v275_v21 }
  0x5b   :  { %280 = vmatprep.subr.bf16.mxu0 %v279_v24 }
  0x62   :  { %282 = vmatpush3.bf16.xpose.msra.mxu0 %v279_v24 }
  0x69   :  { %249 = vmatmul.mubr.f32.vlgmr.msra.gmra.mrb[0].mxu0 %v55_v25 }
 0x13c   :  { %v250_v27 = vpop.f32.mrb[0].mxu0 }
 0x13d   :  { %v164_v29 = vmul.f32 %v250_v27, %v196_v26  ;;  %v138_v30 = vpop.f32.mrb[1].mxu0 }
 0x13e   :  { %v163_v31 = vmul.f32 %v196_v26, %v138_v30 }
 0x13f   :  { %v173_v32 = vadd.f32 %v197_v28, %v164_v29 }
 0x140   :  { %v172_v33 = vadd.f32 %v197_v28, %v163_v31 }
 0x141   :  { %v175_v34 = vmax.f32 %v173_v32, 0.0 }
 0x142   :  { %v174_v35 = vmax.f32 %v172_v33, 0.0 }
 0x143   :  { %177 = vst [vmem:[#allocation8 + $0x8] sm:$0xff] %v175_v34 }
 0x144   :  { %176 = vst [vmem:[#allocation8] sm:$0xff] %v174_v35 }
 0x145   :  { %343 = shalt.err (!%p340_p6)
}
 0x146   :  { %s344_s20 = scalar_lea.hbm %s445_s4, 256 }
 0x147   :  { %p345_p7 = scmp.ne.s32.totalorder %s445_s4, %s344_s20  ;;  %p348_p8 = scmp.lt.u32.totalorder %s344_s20, %s445_s4 }
 0x149   :  { %p350_p9 = pnand %p348_p8, %p345_p7 }
 0x14b   :  { %353 = shalt.err (!%p350_p9)
}
 0x14c   :  { %189 = dma.vmem_to_hbm [thread:$0]  %s184_s18, 256, %s445_s4, [#allocation5], %s361_s25, %s361_s25, %s362_s26  }
 0x14d   :  { %358 = dma.done.wait [#allocation5], 256  }
 0x14e   :  { %359 = vsyncadd [#allocation5], 4294967040 }
 0x14f   :  { %193 = vsyncpa [#allocation4], 1 }
 0x150   :  { %194 = vsyncpa [#allocation7], 1 }
 0x151   :  { %195 = vsyncpa [#allocation5], 1 }

</bundles_post_ra>
